<compile_context>
chip_gen: v7x
topology: tpu7x:2x2x1
jax: 0.10.0
libtpu: 0.0.40
codegen_flags: <defaults>
</compile_context>

<pallas_src>
import functools

import jax
import jax.numpy as jnp
from jax.experimental import pallas as pl
from jax.experimental.pallas import tpu as pltpu


_LANE_CHUNK = 512  # in-kernel sub-chunk along the lane (batch) axis


def _sigmoid(z):
    # sigmoid(z) == 0.5 * (tanh(z / 2) + 1): a single EUP transcendental per vreg
    # instead of exp + divide.
    return 0.5 * (jnp.tanh(0.5 * z) + 1.0)


def make_vpinn_stack_kernel(n, d, uls, layer_counts, TB, LC):
    """Kernel over one feature-major (n, TB) tile applying a stack of VPINN modules.

    Ref order: (xy_ref, W0, b0, W1, b1, ..., out_ref). Weights use PyTorch layout
    W: (out, in), b: (out, 1); each layer computes sigmoid(W @ h + b), identical to
    nn.Linear + Sigmoid acting on the transposed activations.
    """
    num_chunks = TB // LC
    assert num_chunks * LC == TB

    def kernel(xy_ref, *refs):
        out_ref = refs[-1]
        wb = refs[:-1]

        # Fully-unrolled chunk loop with STATIC lane offsets (free slicing, perfect
        # alignment info for Mosaic). Per-chunk live activations are (width, LC)
        # f32 -> <= 16 vregs at LC=512, so large DMA tiles never force spills.
        for c in range(num_chunks):
            sl = slice(c * LC, (c + 1) * LC)
            xy = xy_ref[:, sl]                   # (n, LC), batch along lanes
            x = xy[:d, :]                        # (d, LC)
            y = xy[d:, :]                        # (n - d, LC)

            off = 0
            for ul, L in zip(uls, layer_counts):
                h = y if ul == "up" else x       # FCNet input per module orientation
                for i in range(L):
                    W = wb[off + 2 * i][...]     # (out, in)  -- VMEM-resident
                    b = wb[off + 2 * i + 1][...] # (out, 1)   -- broadcasts over lanes
                    z = jnp.dot(W, h, preferred_element_type=jnp.float32) + b
                    h = _sigmoid(z)
                off += 2 * L
                if ul == "up":
                    x = x + h                    # hstack([x + m(y), y])
                else:
                    y = y + h                    # hstack([x, y + m(x)])

            # One unmasked, lane-dense store per chunk.
            out_ref[:, sl] = jnp.concatenate([x, y], axis=0)

    return kernel


def _choose_batch_tile(B: int) -> int:
    # Largest lane-aligned tile dividing B that still leaves >= 2 grid steps, so the
    # "parallel" batch axis can be sharded across v7x's 2 TensorCores. Capped at 4096
    # (an (8, 4096) f32 tile is 128 KiB -> trivially VMEM-safe, <= 8 in-kernel chunks).
    candidates = (4096, 2048, 1024, 512, 256, 128)
    for tb in candidates:
        if B % tb == 0 and B // tb >= 2:
            return tb
    for tb in candidates:            # small batch: accept a single grid step
        if B % tb == 0:
            return tb
    return B                         # ragged batch: single whole-array block


@functools.partial(jax.jit, static_argnames=("n", "d", "uls", "feature_major"))
def vpinn_stack_forward(xy, params_list, *, n, d, uls, feature_major=False):
    """Apply a stack of VPINN modules in ONE pallas_call.

    xy: (B, n) if feature_major=False (PyTorch drop-in layout; one transpose per
        stack), or (n, B) if feature_major=True (no HBM transposes at all).
    params_list: tuple (one per module) of flat tuples (W0, b0, W1, b1, ...),
        W: (out, in), b: (out, 1).
    uls: tuple of 'up'/'low', one per module.
    """
    if feature_major:
        xy_t = xy
        B = xy.shape[1]
    else:
        B = xy.shape[0]
        xy_t = xy.T                  # single transpose per *stack*, not per module

    flat_params = tuple(p for mp in params_list for p in mp)
    layer_counts = tuple(len(mp) // 2 for mp in params_list)

    TB = _choose_batch_tile(B)
    LC = _LANE_CHUNK if TB % _LANE_CHUNK == 0 else TB
    grid = (B // TB,)

    kernel = make_vpinn_stack_kernel(n, d, uls, layer_counts, TB, LC)

    io_spec = pl.BlockSpec((n, TB), lambda i: (0, i))
    # Whole-array blocks with constant index_maps: weights/biases are DMA'd into
    # VMEM once and stay resident across all grid steps.
    wb_specs = [pl.BlockSpec(p.shape, lambda i: (0, 0)) for p in flat_params]

    out_t = pl.pallas_call(
        kernel,
        out_shape=jax.ShapeDtypeStruct((n, B), jnp.float32),
        grid=grid,
        in_specs=[io_spec] + wb_specs,
        out_specs=io_spec,
        compiler_params=pltpu.CompilerParams(
            dimension_semantics=("parallel",),   # batch steps shard over v7x's 2 TCs
            vmem_limit_bytes=32 * 1024 * 1024,   # explicit, safe on v5e/v6e/v7x
        ),
    )(xy_t, *flat_params)

    return out_t if feature_major else out_t.T


def vpinn_forward(xy, params, *, n, d, ul):
    """Single-module forward, drop-in (B, n) -> (B, n). Prefer vpinn_stack_forward
    with feature_major=True (or a fused multi-module stack) to avoid/amortize the
    wrapper-level HBM transposes."""
    return vpinn_stack_forward(xy, (tuple(params),), n=n, d=d, uls=(ul,))


def init_vpinn_params(key, n, d, ul, nlayers, width):
    """Deterministic parameter init mirroring FCNet's layer shapes.

    Returns a flat tuple (W0, b0, W1, b1, ...), W: (out, in) (PyTorch layout),
    b: (out, 1), using nn.Linear's fan-in uniform init scale.
    """
    if ul == "up":
        indim, outdim = n - d, d
    elif ul == "low":
        indim, outdim = d, n - d
    else:
        raise ValueError("ul must be 'up' or 'low'")

    dims = [indim] + [width] * (nlayers + 1) + [outdim]
    params = []
    for i in range(len(dims) - 1):
        fan_in, fan_out = dims[i], dims[i + 1]
        kw, kb, key = jax.random.split(key, 3)
        bound = 1.0 / (fan_in ** 0.5)
        W = jax.random.uniform(kw, (fan_out, fan_in), jnp.float32, -bound, bound)
        b = jax.random.uniform(kb, (fan_out, 1), jnp.float32, -bound, bound)
        params.extend([W, b])
    return tuple(params)


def vpinn_stack_forward_ref(xy, params_list, uls, *, d):
    """Pure-JAX batch-major reference mirroring the PyTorch forward (module chain)."""
    x, y = xy[:, :d], xy[:, d:]
    for params, ul in zip(params_list, uls):
        h = y if ul == "up" else x
        for i in range(len(params) // 2):
            W, b = params[2 * i], params[2 * i + 1]       # (out, in), (out, 1)
            h = jax.nn.sigmoid(h @ W.T + b[:, 0])
        if ul == "up":
            x = x + h
        else:
            y = y + h
    return jnp.concatenate([x, y], axis=1)


if __name__ == "__main__":
    n, d = 8, 4
    nlayers, width = 2, 32
    TOL = dict(atol=1e-4, rtol=1e-4)   # f32; kernel uses tanh-form sigmoid + MXU matmul

    key = jax.random.PRNGKey(0)
    k_x, k_up, k_low, k_x2 = jax.random.split(key, 4)

    # --- Single modules, drop-in (B, n) API. B=256 -> TB=128, grid=(2,): exercises
    #     the multi-step pipeline and the "parallel" batch-sharding path.
    B = 256
    xy = jax.random.normal(k_x, (B, n), jnp.float32)
    params_up = init_vpinn_params(k_up, n, d, "up", nlayers, width)
    params_low = init_vpinn_params(k_low, n, d, "low", nlayers, width)

    for ul, params in (("up", params_up), ("low", params_low)):
        ref = vpinn_stack_forward_ref(xy, (params,), (ul,), d=d)
        out = jax.block_until_ready(vpinn_forward(xy, params, n=n, d=d, ul=ul))
        assert out.shape == (B, n)
        assert jnp.allclose(out, ref, **TOL), f"single-module mismatch ({ul})"

    # --- Feature-major path: no HBM transposes around the kernel at all.
    ref_up = vpinn_stack_forward_ref(xy, (params_up,), ("up",), d=d)
    out_fm = jax.block_until_ready(
        vpinn_stack_forward(xy.T, (params_up,), n=n, d=d, uls=("up",),
                            feature_major=True))
    assert out_fm.shape == (n, B)
    assert jnp.allclose(out_fm.T, ref_up, **TOL), "feature-major mismatch"

    # --- Fused up+low coupling stack in ONE pallas_call (transpose paid once per
    #     stack). B=2048 -> TB=1024, grid=(2,), two unrolled 512-lane chunks inside
    #     the kernel (exercises the in-kernel chunk loop).
    B2 = 2048
    xy2 = jax.random.normal(k_x2, (B2, n), jnp.float32)
    ref2 = vpinn_stack_forward_ref(xy2, (params_up, params_low), ("up", "low"), d=d)
    out2 = jax.block_until_ready(
        vpinn_stack_forward(xy2, (params_up, params_low), n=n, d=d,
                            uls=("up", "low")))
    assert out2.shape == (B2, n)
    assert jnp.allclose(out2, ref2, **TOL), "fused-stack mismatch"

    print("KERNEL_OK")
</pallas_src>

<mosaic_0001>
module attributes {stable_mosaic.version = 11 : i64} {
  func.func @kernel(%arg0: i32, %arg1: memref<8x128xf32, #tpu.memory_space<vmem>>, %arg2: memref<32x4xf32, #tpu.memory_space<vmem>>, %arg3: memref<32x1xf32, #tpu.memory_space<vmem>>, %arg4: memref<32x32xf32, #tpu.memory_space<vmem>>, %arg5: memref<32x1xf32, #tpu.memory_space<vmem>>, %arg6: memref<32x32xf32, #tpu.memory_space<vmem>>, %arg7: memref<32x1xf32, #tpu.memory_space<vmem>>, %arg8: memref<4x32xf32, #tpu.memory_space<vmem>>, %arg9: memref<4x1xf32, #tpu.memory_space<vmem>>, %arg10: memref<8x128xf32, #tpu.memory_space<vmem>>) attributes {dimension_semantics = [#tpu.dimension_semantics<parallel>], iteration_bounds = array<i64: 2>, scalar_prefetch = 0 : i64, scratch_operands = 0 : i64, tpu.core_type = #tpu.core_type<tc>, window_params = [{transform_indices = @transform_0, window_bounds = array<i64: 8, 128>}, {pipeline_mode = #tpu.pipeline_mode<synchronous>, transform_indices = @transform_1, window_bounds = array<i64: 32, 4>}, {pipeline_mode = #tpu.pipeline_mode<synchronous>, transform_indices = @transform_2, window_bounds = array<i64: 32, 1>}, {pipeline_mode = #tpu.pipeline_mode<synchronous>, transform_indices = @transform_3, window_bounds = array<i64: 32, 32>}, {pipeline_mode = #tpu.pipeline_mode<synchronous>, transform_indices = @transform_4, window_bounds = array<i64: 32, 1>}, {pipeline_mode = #tpu.pipeline_mode<synchronous>, transform_indices = @transform_5, window_bounds = array<i64: 32, 32>}, {pipeline_mode = #tpu.pipeline_mode<synchronous>, transform_indices = @transform_6, window_bounds = array<i64: 32, 1>}, {pipeline_mode = #tpu.pipeline_mode<synchronous>, transform_indices = @transform_7, window_bounds = array<i64: 4, 32>}, {pipeline_mode = #tpu.pipeline_mode<synchronous>, transform_indices = @transform_8, window_bounds = array<i64: 4, 1>}, {transform_indices = @transform_9, window_bounds = array<i64: 8, 128>}]} {
    %c0 = arith.constant 0 : index
    %c0_0 = arith.constant 0 : index
    %0 = vector.load %arg1[%c0, %c0_0] : memref<8x128xf32, #tpu.memory_space<vmem>>, vector<8x128xf32>
    %1 = vector.extract_strided_slice %0 {offsets = [0, 0], sizes = [4, 128], strides = [1, 1]} : vector<8x128xf32> to vector<4x128xf32>
    %2 = vector.extract_strided_slice %0 {offsets = [4, 0], sizes = [4, 128], strides = [1, 1]} : vector<8x128xf32> to vector<4x128xf32>
    %c0_1 = arith.constant 0 : index
    %c0_2 = arith.constant 0 : index
    %3 = vector.load %arg2[%c0_1, %c0_2] : memref<32x4xf32, #tpu.memory_space<vmem>>, vector<32x4xf32>
    %c0_3 = arith.constant 0 : index
    %c0_4 = arith.constant 0 : index
    %4 = vector.load %arg3[%c0_3, %c0_4] : memref<32x1xf32, #tpu.memory_space<vmem>>, vector<32x1xf32>
    %cst = arith.constant dense<0.000000e+00> : vector<32x128xf32>
    %5 = tpu.matmul %3, %2, %cst {dimension_numbers = #tpu.dot_dimension_numbers<[1], [0], [0], [1], [0, 0, 1, 1], [], []>} : vector<32x4xf32>, vector<4x128xf32>, vector<32x128xf32> -> vector<32x128xf32>
    %6 = vector.broadcast %4 : vector<32x1xf32> to vector<32x128xf32>
    %7 = arith.addf %5, %6 : vector<32x128xf32>
    %cst_5 = arith.constant 5.000000e-01 : f32
    %8 = vector.broadcast %cst_5 : f32 to vector<32x128xf32>
    %9 = arith.mulf %8, %7 : vector<32x128xf32>
    %10 = math.tanh %9 : vector<32x128xf32>
    %cst_6 = arith.constant 1.000000e+00 : f32
    %11 = vector.broadcast %cst_6 : f32 to vector<32x128xf32>
    %12 = arith.addf %10, %11 : vector<32x128xf32>
    %cst_7 = arith.constant 5.000000e-01 : f32
    %13 = vector.broadcast %cst_7 : f32 to vector<32x128xf32>
    %14 = arith.mulf %13, %12 : vector<32x128xf32>
    %c0_8 = arith.constant 0 : index
    %c0_9 = arith.constant 0 : index
    %15 = vector.load %arg4[%c0_8, %c0_9] : memref<32x32xf32, #tpu.memory_space<vmem>>, vector<32x32xf32>
    %c0_10 = arith.constant 0 : index
    %c0_11 = arith.constant 0 : index
    %16 = vector.load %arg5[%c0_10, %c0_11] : memref<32x1xf32, #tpu.memory_space<vmem>>, vector<32x1xf32>
    %cst_12 = arith.constant dense<0.000000e+00> : vector<32x128xf32>
    %17 = tpu.matmul %15, %14, %cst_12 {dimension_numbers = #tpu.dot_dimension_numbers<[1], [0], [0], [1], [0, 0, 1, 1], [], []>} : vector<32x32xf32>, vector<32x128xf32>, vector<32x128xf32> -> vector<32x128xf32>
    %18 = vector.broadcast %16 : vector<32x1xf32> to vector<32x128xf32>
    %19 = arith.addf %17, %18 : vector<32x128xf32>
    %cst_13 = arith.constant 5.000000e-01 : f32
    %20 = vector.broadcast %cst_13 : f32 to vector<32x128xf32>
    %21 = arith.mulf %20, %19 : vector<32x128xf32>
    %22 = math.tanh %21 : vector<32x128xf32>
    %cst_14 = arith.constant 1.000000e+00 : f32
    %23 = vector.broadcast %cst_14 : f32 to vector<32x128xf32>
    %24 = arith.addf %22, %23 : vector<32x128xf32>
    %cst_15 = arith.constant 5.000000e-01 : f32
    %25 = vector.broadcast %cst_15 : f32 to vector<32x128xf32>
    %26 = arith.mulf %25, %24 : vector<32x128xf32>
    %c0_16 = arith.constant 0 : index
    %c0_17 = arith.constant 0 : index
    %27 = vector.load %arg6[%c0_16, %c0_17] : memref<32x32xf32, #tpu.memory_space<vmem>>, vector<32x32xf32>
    %c0_18 = arith.constant 0 : index
    %c0_19 = arith.constant 0 : index
    %28 = vector.load %arg7[%c0_18, %c0_19] : memref<32x1xf32, #tpu.memory_space<vmem>>, vector<32x1xf32>
    %cst_20 = arith.constant dense<0.000000e+00> : vector<32x128xf32>
    %29 = tpu.matmul %27, %26, %cst_20 {dimension_numbers = #tpu.dot_dimension_numbers<[1], [0], [0], [1], [0, 0, 1, 1], [], []>} : vector<32x32xf32>, vector<32x128xf32>, vector<32x128xf32> -> vector<32x128xf32>
    %30 = vector.broadcast %28 : vector<32x1xf32> to vector<32x128xf32>
    %31 = arith.addf %29, %30 : vector<32x128xf32>
    %cst_21 = arith.constant 5.000000e-01 : f32
    %32 = vector.broadcast %cst_21 : f32 to vector<32x128xf32>
    %33 = arith.mulf %32, %31 : vector<32x128xf32>
    %34 = math.tanh %33 : vector<32x128xf32>
    %cst_22 = arith.constant 1.000000e+00 : f32
    %35 = vector.broadcast %cst_22 : f32 to vector<32x128xf32>
    %36 = arith.addf %34, %35 : vector<32x128xf32>
    %cst_23 = arith.constant 5.000000e-01 : f32
    %37 = vector.broadcast %cst_23 : f32 to vector<32x128xf32>
    %38 = arith.mulf %37, %36 : vector<32x128xf32>
    %c0_24 = arith.constant 0 : index
    %c0_25 = arith.constant 0 : index
    %39 = vector.load %arg8[%c0_24, %c0_25] : memref<4x32xf32, #tpu.memory_space<vmem>>, vector<4x32xf32>
    %c0_26 = arith.constant 0 : index
    %c0_27 = arith.constant 0 : index
    %40 = vector.load %arg9[%c0_26, %c0_27] : memref<4x1xf32, #tpu.memory_space<vmem>>, vector<4x1xf32>
    %cst_28 = arith.constant dense<0.000000e+00> : vector<4x128xf32>
    %41 = tpu.matmul %39, %38, %cst_28 {dimension_numbers = #tpu.dot_dimension_numbers<[1], [0], [0], [1], [0, 0, 1, 1], [], []>} : vector<4x32xf32>, vector<32x128xf32>, vector<4x128xf32> -> vector<4x128xf32>
    %42 = vector.broadcast %40 : vector<4x1xf32> to vector<4x128xf32>
    %43 = arith.addf %41, %42 : vector<4x128xf32>
    %cst_29 = arith.constant 5.000000e-01 : f32
    %44 = vector.broadcast %cst_29 : f32 to vector<4x128xf32>
    %45 = arith.mulf %44, %43 : vector<4x128xf32>
    %46 = math.tanh %45 : vector<4x128xf32>
    %cst_30 = arith.constant 1.000000e+00 : f32
    %47 = vector.broadcast %cst_30 : f32 to vector<4x128xf32>
    %48 = arith.addf %46, %47 : vector<4x128xf32>
    %cst_31 = arith.constant 5.000000e-01 : f32
    %49 = vector.broadcast %cst_31 : f32 to vector<4x128xf32>
    %50 = arith.mulf %49, %48 : vector<4x128xf32>
    %51 = arith.addf %1, %50 : vector<4x128xf32>
    %52 = tpu.concatenate %51, %2 in 0 : vector<4x128xf32>, vector<4x128xf32> -> vector<8x128xf32>
    %c0_32 = arith.constant 0 : index
    %c0_33 = arith.constant 0 : index
    %53 = vector.load %arg10[%c0_32, %c0_33] : memref<8x128xf32, #tpu.memory_space<vmem>>, vector<8x128xf32>
    tpu.vector_store %arg10[%c0_32, %c0_33], %52 {strides = array<i32>} : memref<8x128xf32, #tpu.memory_space<vmem>>, vector<8x128xf32>,
    return
  }
  func.func @transform_0(%arg0: i32) -> (i32, i32) {
    %c0_i32 = arith.constant 0 : i32
    %c0_i32_0 = arith.constant 0 : i32
    return %c0_i32, %arg0 : i32, i32
  }
  func.func @transform_1(%arg0: i32) -> (i32, i32) {
    %c0_i32 = arith.constant 0 : i32
    %c0_i32_0 = arith.constant 0 : i32
    %c0_i32_1 = arith.constant 0 : i32
    return %c0_i32, %c0_i32_0 : i32, i32
  }
  func.func @transform_2(%arg0: i32) -> (i32, i32) {
    %c0_i32 = arith.constant 0 : i32
    %c0_i32_0 = arith.constant 0 : i32
    %c0_i32_1 = arith.constant 0 : i32
    return %c0_i32, %c0_i32_0 : i32, i32
  }
  func.func @transform_3(%arg0: i32) -> (i32, i32) {
    %c0_i32 = arith.constant 0 : i32
    %c0_i32_0 = arith.constant 0 : i32
    %c0_i32_1 = arith.constant 0 : i32
    return %c0_i32, %c0_i32_0 : i32, i32
  }
  func.func @transform_4(%arg0: i32) -> (i32, i32) {
    %c0_i32 = arith.constant 0 : i32
    %c0_i32_0 = arith.constant 0 : i32
    %c0_i32_1 = arith.constant 0 : i32
    return %c0_i32, %c0_i32_0 : i32, i32
  }
  func.func @transform_5(%arg0: i32) -> (i32, i32) {
    %c0_i32 = arith.constant 0 : i32
    %c0_i32_0 = arith.constant 0 : i32
    %c0_i32_1 = arith.constant 0 : i32
    return %c0_i32, %c0_i32_0 : i32, i32
  }
  func.func @transform_6(%arg0: i32) -> (i32, i32) {
    %c0_i32 = arith.constant 0 : i32
    %c0_i32_0 = arith.constant 0 : i32
    %c0_i32_1 = arith.constant 0 : i32
    return %c0_i32, %c0_i32_0 : i32, i32
  }
  func.func @transform_7(%arg0: i32) -> (i32, i32) {
    %c0_i32 = arith.constant 0 : i32
    %c0_i32_0 = arith.constant 0 : i32
    %c0_i32_1 = arith.constant 0 : i32
    return %c0_i32, %c0_i32_0 : i32, i32
  }
  func.func @transform_8(%arg0: i32) -> (i32, i32) {
    %c0_i32 = arith.constant 0 : i32
    %c0_i32_0 = arith.constant 0 : i32
    %c0_i32_1 = arith.constant 0 : i32
    return %c0_i32, %c0_i32_0 : i32, i32
  }
  func.func @transform_9(%arg0: i32) -> (i32, i32) {
    %c0_i32 = arith.constant 0 : i32
    %c0_i32_0 = arith.constant 0 : i32
    return %c0_i32, %arg0 : i32, i32
  }
}

</mosaic_0001>

<bundles_post_ra>
// kernel: vpinn_stack_forward.1
= control target key start
LH: loop header
LB: loop body
LE: loop exit
PB: predicated region body
PF: predicated region fallthrough
CT: control target
= control target key end

     0   :  { %14 = vsyncpa [#allocation3], 0  ;;  %s1427_s0 = inlined_call_operand.vmem [shape: f32[8,256], index: 0, kind: input, shape index: {}]   ;;  %s1428_s1 = inlined_call_operand.vmem [shape: f32[32,4], index: 1, kind: input, shape index: {}]   ;;  %s1429_s2 = inlined_call_operand.vmem [shape: f32[32,1], index: 2, kind: input, shape index: {}]   ;;  %s1430_s3 = inlined_call_operand.vmem [shape: f32[32,32], index: 3, kind: input, shape index: {}]   ;;  %s1431_s4 = inlined_call_operand.vmem [shape: f32[32,1], index: 4, kind: input, shape index: {}]   ;;  %s1432_s5 = inlined_call_operand.vmem [shape: f32[32,32], index: 5, kind: input, shape index: {}]   ;;  %s1433_s6 = inlined_call_operand.vmem [shape: f32[32,1], index: 6, kind: input, shape index: {}]   ;;  %s1434_s7 = inlined_call_operand.vmem [shape: f32[4,32], index: 7, kind: input, shape index: {}]   ;;  %s1435_s8 = inlined_call_operand.vmem [shape: f32[4,1], index: 8, kind: input, shape index: {}]   ;;  %s1436_s9 = inlined_call_operand.hbm [shape: f32[8,256], index: 9, kind: output, shape index: {}]  }
   0x1   :  { %16 = vsyncpa [#allocation3 + $0x1], 0  ;;  %s1228_s30 = smov 0   ;;  %s1230_s10 = smov 0  }
   0x2   :  { %s1232_s11 = smov 0   ;;  %s1234_s12 = smov 0  }
   0x3 LB: > { %s1249_s13 = sadd.s32 4294967295, %s1171_s12   ;;  %s919_s14 = sadd.s32 4294967294, %s1171_s12   ;;  %s1171_s12 = sphi %s1234_s12, %s1442_s12   ;;  %s1167_s11 = sphi %s1232_s11, %s1441_s11   ;;  %s1163_s10 = sphi %s1230_s10, %s1440_s10   ;;  %s1159_s30 = sphi %s1228_s30, %s1439_s30  }
   0x4   : > { %s1253_s15 = sadd.s32 1, %s1171_s12   ;;  %s223_s16 = sadd.s32 1, %s1167_s11 }
   0x5   : > { %s220_s17 = ssub.s32 %s1171_s12, %s1253_s15  ;;  %p233_p0 = scmp.ne.s32.totalorder %s1167_s11, %s1163_s10 }
   0x6   : > { %p221_p1 = scmp.eq.s32.totalorder %s220_s17, 0  ;;  %p234_p2 = scmp.eq.s32.totalorder %s1249_s13, 1 }
   0x7   : > { %p239_p3 = scmp.ne.s32.totalorder %s1163_s10, %s1159_s30  ;;  %p240_p4 = scmp.eq.s32.totalorder %s919_s14, 1 }
   0x8   : > { %s1264_s18 = scalar_select %p221_p1, %s1167_s11, %s223_s16  }
   0x9   : > { %p1266_p5 = por %p234_p2, %p233_p0  ;;  %p1270_p6 = por %p240_p4, %p239_p3 }
   0xa   : > { %p922_p7 = scmp.ge.s32.totalorder %s1171_s12, 1  ;;  %p289_p8 = scmp.lt.s32.totalorder %s1171_s12, 3 }
   0xc   : > { %p290_p9 = pnand %p922_p7, %p289_p8 }
   0xd   : > { %p324_p10 = scmp.lt.s32.totalorder (!%p290_p9), %s1249_s13, 1  ;;  %v329_v0 = vld [vmem:[%s1428_s1] sm:$0xff] (!%p290_p9)  ;;  %vm359_vm0 = vcmask (!%p290_p9), 31744   ;;  %v1173_v2 = vmov (!%p290_p9), 0   ;;  %v335_v3 = vld [vmem:[%s1429_s2 + $0x10] sm:$0xff] (!%p290_p9)  ;;  %v334_v4 = vld [vmem:[%s1429_s2 + $0x8] sm:$0xff] (!%p290_p9) }
   0xe   : > { %293 = sbr.rel (%p290_p9) target bundleno = 1003 (0x3eb), region = 56  ;;  %971 = vmatprep.mubr.msk.f32.mxu0 (!%p290_p9), %vm359_vm0, %v329_v0  ;;  %v333_v1 = vld [vmem:[%s1429_s2] sm:$0xff] (!%p290_p9)  ;;  %1081 = vset.pattern.permute.xlu0 (!%p290_p9), %v1173_v2  ;;  %v336_v5 = vld [vmem:[%s1429_s2 + $0x18] sm:$0xff] (!%p290_p9)  ;;  %vm372_vm1 = vcmask (!%p290_p9), 1043456   ;;  %v330_v8 = vld [vmem:[%s1428_s1 + $0x8] sm:$0xff] (!%p290_p9)  ;;  %vm504_vm2 = vcmask (!%p290_p9), 261120  }
   0xf   : > { %1082 = vset.pattern.permute.xlu1 (!%p290_p9), %v1173_v2  ;;  %339 = vperm.xlu0 (!%p290_p9), %1081, %v333_v1   ;;  %v480_v9 = vld [vmem:[%s1431_s4] sm:$0xff] (!%p290_p9)  ;;  %v331_v10 = vld [vmem:[%s1428_s1 + $0x10] sm:$0xff] (!%p290_p9)  ;;  %v481_v11 = vld [vmem:[%s1431_s4 + $0x8] sm:$0xff] (!%p290_p9)  ;;  %vm1175_vm3 = vmmov (!%p290_p9), 0   ;;  %s940_s17 = sshll.u32 (!%p290_p9), %s1249_s13, 7  ;;  %s1177_s27 = smov (!%p290_p9), [#allocation2]  }
  0x10   : > { %349 = vperm.xlu1 (!%p290_p9), %1082, %v335_v3   ;;  %v332_v12 = vld [vmem:[%s1428_s1 + $0x18] sm:$0xff] (!%p290_p9)  ;;  %v482_v13 = vld [vmem:[%s1431_s4 + $0x10] sm:$0xff] (!%p290_p9)  ;;  %v622_v15 = vld [vmem:[%s1433_s6] sm:$0xff] (!%p290_p9)  ;;  %s1113_s29 = sshll.u32 (!%p290_p9), %s1177_s27, 4  ;;  %s1114_s29 = int_to_ptr.vmem [resolvable:$false] %s1113_s29 }
  0x11   : > { %v483_v14 = vld [vmem:[%s1431_s4 + $0x18] sm:$0xff] (!%p290_p9)  ;;  %v623_v16 = vld [vmem:[%s1433_s6 + $0x8] sm:$0xff] (!%p290_p9)  ;;  %v624_v17 = vld [vmem:[%s1433_s6 + $0x10] sm:$0xff] (!%p290_p9)  ;;  %s1115_s14 = scalar_lea.vmem (!%p290_p9), %s1114_s29, 256 }
  0x12   : > { %v625_v18 = vld [vmem:[%s1433_s6 + $0x18] sm:$0xff] (!%p290_p9)  ;;  %v760_v19 = vld [vmem:[%s1435_s8] sm:$0xf] (!%p290_p9)  ;;  %v477_v51 = vld [vmem:[%s1430_s3 + $0x8] sm:$0xff] (!%p290_p9) }
  0x13   : > { %344 = vperm.xlu0 (!%p290_p9), %1081, %v334_v4   ;;  %v476_v20 = vld [vmem:[%s1430_s3] sm:$0xff] (!%p290_p9)  ;;  %v478_v52 = vld [vmem:[%s1430_s3 + $0x10] sm:$0xff] (!%p290_p9)  ;;  %v479_v53 = vld [vmem:[%s1430_s3 + $0x18] sm:$0xff] (!%p290_p9) }
  0x14   : > { %354 = vperm.xlu1 (!%p290_p9), %1082, %v336_v5   ;;  %985 = vmatprep.mubr.msk.f32.mxu1 (!%p290_p9), %vm504_vm2, %v476_v20  ;;  %v618_v54 = vld [vmem:[%s1432_s5] sm:$0xff] (!%p290_p9) }
  0x15   : > { %s325_s25 = scalar_select %p324_p10, %s1249_s13, 1 }
  0x17   : > { %s924_s28 = sshll.u32 %s325_s25, 3  ;;  %486 = vperm.xlu0 %1081, %v480_v9   ;;  %s1383_s25 = scalar_lea.hbm %s1436_s9, %s940_s17 }
  0x18   : > { %s327_s23 = scalar_lea.vmem %s1427_s0, %s924_s28  ;;  %491 = vperm.xlu1 %1082, %v481_v11   ;;  %s321_s28 = sand.u32 1, %s1163_s10  }
  0x19   : > { %v1297_v6 = vld [vmem:[%s327_s23] sm:$0xff]  ;;  %s923_s16 = sshll.u32 %s321_s28, 3  ;;  %s847_s26 = scalar_lea.sflag [#allocation3], %s321_s28 }
  0x1a   : > { %v358_v7 = vrot.slane %v1297_v6, 4  ;;  %s323_s21 = scalar_lea.vmem [#allocation2], %s923_s16 }
  0x1b   : > { %496 = vperm.xlu0 %1081, %v482_v13   ;;  %s860_s22 = sshll.u32 %s323_s21, 4  ;;  %s1385_s22 = int_to_ptr.vmem [resolvable:$true] %s860_s22 }
  0x1c   : > { %969 = vmatprep.subr.msk.mxu0 %vm372_vm1, %v358_v7  ;;  %501 = vperm.xlu1 %1082, %v483_v14   ;;  %s1109_s13 = scalar_lea.vmem %s1385_s22, 128  ;;  %p1116_p0 = scmp.lt.s32.totalorder %s1385_s22, %s1114_s29 }
  0x1d   : > { %970 = vmatpush3.msk.msra.mxu0 %vm372_vm1, %v358_v7  ;;  %p1110_p11 = scmp.ne.s32.totalorder %s1385_s22, %s1109_s13  ;;  %p1117_p1 = scmp.lt.s32.totalorder %s1115_s14, %s1109_s13 }
  0x1e   : > { %972 = vmatmul.mubr.msk.f32.vlgmr.msra.gmra.mrb[0].mxu0 %vm359_vm0, %v330_v8 }
  0x1f   : > { %974 = vmatprep.mubr.msk.f32.mxu0 %vm359_vm0, %v331_v10  ;;  %628 = vperm.xlu0 %1081, %v622_v15   ;;  %p1111_p12 = pnand %p1110_p11, %p1266_p5  ;;  %p1118_p2 = por %p1117_p1, %p1116_p0 }
  0x20   : > { %633 = vperm.xlu1 %1082, %v623_v16  }
  0x21   : > { %p1112_p13 = pneg %p1111_p12 }
  0x22   : > { %975 = vmatmul.mubr.msk.f32.gmra.mrb[2].mxu0 %vm359_vm0, %v332_v12 }
  0x23   : > { %638 = vperm.xlu0 %1081, %v624_v17   ;;  %999 = vmatprep.mubr.msk.f32.mxu0 %vm504_vm2, %v618_v54  ;;  %p1119_p3 = pnand %p1118_p2, %p1112_p13 }
  0x24   : > { %643 = vperm.xlu1 %1082, %v625_v18  }
  0x27   : > { %763 = vperm.xlu0 %1081, %v760_v19  }
  0x8e   : > { %v340_v21 = vpop.permute.xlu0 %339 }
  0x8f   : > { %v350_v22 = vpop.permute.xlu1 %349 }
  0x92   : > { %v345_v23 = vpop.permute.xlu0 %344 }
  0x93   : > { %v355_v29 = vpop.permute.xlu1 %354 }
  0x96   : > { %v487_v56 = vpop.permute.xlu0 %486 }
  0x97   : > { %v492_v55 = vpop.permute.xlu1 %491 }
  0x9a   : > { %v497_v1 = vpop.permute.xlu0 %496 }
  0x9b   : > { %v502_v62 = vpop.permute.xlu1 %501 }
  0xf1   : > { %v973_v24 = vpop.f32.mrb[0].mxu0 }
  0xf2   : > { %v447_v25 = vadd.f32 %v973_v24, %v345_v23  ;;  %v441_v26 = vpop.f32.mrb[1].mxu0  ;;  %v620_v23 = vld [vmem:[%s1432_s5 + $0x10] sm:$0xff]  ;;  %v621_v24 = vld [vmem:[%s1432_s5 + $0x18] sm:$0xff] }
  0xf3   : > { %v442_v27 = vadd.f32 %v441_v26, %v340_v21  ;;  %v1176_v26 = vmov 0.0  }
  0xf4   : > { %v461_v28 = vmul.f32 0.5, %v447_v25  ;;  %v1174_v25 = vmov 0.0|0.0  }
  0xf5   : > { %v460_v30 = vmul.f32 0.5, %v442_v27  ;;  %v976_v31 = vpop.f32.mrb[2].mxu0  ;;  %v634_v27 = vpop.permute.xlu1 %633 }
  0xf6   : > { %1083 = vtanh.f32 %v461_v28  ;;  %v457_v32 = vadd.f32 %v976_v31, %v355_v29  ;;  %v451_v33 = vpop.f32.mrb[3].mxu0  ;;  %v629_v28 = vpop.permute.xlu0 %628 }
  0xf7   : > { %1085 = vtanh.f32 %v460_v30  ;;  %v452_v34 = vadd.f32 %v451_v33, %v350_v22  ;;  %v619_v22 = vld [vmem:[%s1432_s5 + $0x8] sm:$0xff] }
  0xf8   : > { %v463_v35 = vmul.f32 0.5, %v457_v32 }
  0xf9   : > { %v462_v36 = vmul.f32 0.5, %v452_v34  ;;  %v644_v34 = vpop.permute.xlu1 %643 }
  0xfa   : > { %1087 = vtanh.f32 %v463_v35 }
  0xfb   : > { %1089 = vtanh.f32 %v462_v36 }
 0x100   : > { %v1084_v37 = vpop.eup %1083 }
 0x101   : > { %v1086_v38 = vpop.eup %1085  ;;  %v469_v39 = vadd.f32 1.0, %v1084_v37  ;;  %v639_v37 = vpop.permute.xlu0 %638 }
 0x102   : > { %v468_v40 = vadd.f32 1.0, %v1086_v38 }
 0x103   : > { %v473_v41 = vmul.f32 0.5, %v469_v39 }
 0x104   : > { %v1088_v42 = vpop.eup %1087  ;;  %v472_v43 = vmul.f32 0.5, %v468_v40 }
 0x105   : > { %v1090_v44 = vpop.eup %1089  ;;  %v471_v45 = vadd.f32 1.0, %v1088_v42 }
 0x106   : > { %v470_v46 = vadd.f32 1.0, %v1090_v44  ;;  %v1016_v47 = vpack.c.bf16 %v473_v41, %v472_v43 }
 0x107   : > { %v475_v48 = vmul.f32 0.5, %v471_v45 }
 0x108   : > { %v474_v49 = vmul.f32 0.5, %v470_v46  ;;  %1017 = vmatprep.subr.bf16.mxu1 %v1016_v47 }
 0x109   : > { %1019 = vmatpush3.bf16.msra.mxu1 %v1016_v47 }
 0x10a   : > { %v1020_v50 = vpack.c.bf16 %v475_v48, %v474_v49 }
 0x10c   : > { %1021 = vmatprep.subr.bf16.mxu1 %v1020_v50 }
 0x10d   : > { %1023 = vmatpush3.bf16.msra.mxu1 %v1020_v50 }
 0x10e   : > { %1032 = vmatprep.subr.bf16.mxu1 %v1174_v25 }
 0x110   : > { %986 = vmatmul.mubr.msk.f32.vlgmr.msra.gmra.mrb[0].mxu1 %vm504_vm2, %v477_v51 }
 0x111   : > { %988 = vmatprep.mubr.msk.f32.mxu1 %vm504_vm2, %v478_v52 }
 0x114   : > { %989 = vmatmul.mubr.msk.f32.gmra.mrb[2].mxu1 %vm504_vm2, %v479_v53 }
 0x115   : > { %1013 = vmatprep.mubr.msk.f32.mxu1 %vm1175_vm3, %v1176_v26 }
 0x1e3   : > { %v987_v57 = vpop.f32.mrb[0].mxu1 }
 0x1e4   : > { %v589_v58 = vadd.f32 %v987_v57, %v492_v55  ;;  %v583_v59 = vpop.f32.mrb[1].mxu1  ;;  %v759_v57 = vld [vmem:[%s1434_s7] sm:$0xf] }
 0x1e5   : > { %v584_v60 = vadd.f32 %v583_v59, %v487_v56 }
 0x1e6   : > { %v603_v61 = vmul.f32 0.5, %v589_v58  ;;  %v764_v58 = vpop.permute.xlu0 %763 }
 0x1e7   : > { %v602_v63 = vmul.f32 0.5, %v584_v60  ;;  %v990_v0 = vpop.f32.mrb[2].mxu1 }
 0x1e8   : > { %1091 = vtanh.f32 %v603_v61  ;;  %v599_v2 = vadd.f32 %v990_v0, %v502_v62  ;;  %v593_v3 = vpop.f32.mrb[3].mxu1 }
 0x1e9   : > { %1093 = vtanh.f32 %v602_v63  ;;  %v594_v4 = vadd.f32 %v593_v3, %v497_v1 }
 0x1ea   : > { %v605_v5 = vmul.f32 0.5, %v599_v2 }
 0x1eb   : > { %v604_v7 = vmul.f32 0.5, %v594_v4 }
 0x1ec   : > { %1095 = vtanh.f32 %v605_v5 }
 0x1ed   : > { %1097 = vtanh.f32 %v604_v7 }
 0x1f2   : > { %v1092_v8 = vpop.eup %1091 }
 0x1f3   : > { %v1094_v9 = vpop.eup %1093  ;;  %v611_v10 = vadd.f32 1.0, %v1092_v8 }
 0x1f4   : > { %v610_v11 = vadd.f32 1.0, %v1094_v9 }
 0x1f5   : > { %v615_v12 = vmul.f32 0.5, %v611_v10 }
 0x1f6   : > { %v1096_v13 = vpop.eup %1095  ;;  %v614_v14 = vmul.f32 0.5, %v610_v11 }
 0x1f7   : > { %v1098_v15 = vpop.eup %1097  ;;  %v613_v16 = vadd.f32 1.0, %v1096_v13 }
 0x1f8   : > { %v612_v17 = vadd.f32 1.0, %v1098_v15  ;;  %v1024_v18 = vpack.c.bf16 %v615_v12, %v614_v14 }
 0x1f9   : > { %v617_v19 = vmul.f32 0.5, %v613_v16 }
 0x1fa   : > { %v616_v20 = vmul.f32 0.5, %v612_v17  ;;  %1025 = vmatprep.subr.bf16.mxu0 %v1024_v18 }
 0x1fb   : > { %1027 = vmatpush3.bf16.msra.mxu0 %v1024_v18 }
 0x1fc   : > { %v1028_v21 = vpack.c.bf16 %v617_v19, %v616_v20 }
 0x1fe   : > { %1029 = vmatprep.subr.bf16.mxu0 %v1028_v21 }
 0x1ff   : > { %1031 = vmatpush3.bf16.msra.mxu0 %v1028_v21 }
 0x202   : > { %1000 = vmatmul.mubr.msk.f32.vlgmr.msra.gmra.mrb[4].mxu0 %vm504_vm2, %v619_v22 }
 0x203   : > { %1002 = vmatprep.mubr.msk.f32.mxu0 %vm504_vm2, %v620_v23 }
 0x206   : > { %1003 = vmatmul.mubr.msk.f32.gmra.mrb[6].mxu0 %vm504_vm2, %v621_v24 }
 0x2d5   : > { %v1001_v29 = vpop.f32.mrb[4].mxu0 }
 0x2d6   : > { %v730_v30 = vadd.f32 %v1001_v29, %v634_v27  ;;  %v724_v31 = vpop.f32.mrb[5].mxu0 }
 0x2d7   : > { %v725_v32 = vadd.f32 %v724_v31, %v629_v28 }
 0x2d8   : > { %v744_v33 = vmul.f32 0.5, %v730_v30 }
 0x2d9   : > { %v743_v35 = vmul.f32 0.5, %v725_v32  ;;  %v1004_v36 = vpop.f32.mrb[6].mxu0 }
 0x2da   : > { %1099 = vtanh.f32 %v744_v33  ;;  %v740_v38 = vadd.f32 %v1004_v36, %v644_v34  ;;  %v734_v39 = vpop.f32.mrb[7].mxu0 }
 0x2db   : > { %1101 = vtanh.f32 %v743_v35  ;;  %v735_v40 = vadd.f32 %v734_v39, %v639_v37 }
 0x2dc   : > { %v746_v41 = vmul.f32 0.5, %v740_v38 }
 0x2dd   : > { %v745_v42 = vmul.f32 0.5, %v735_v40 }
 0x2de   : > { %1103 = vtanh.f32 %v746_v41 }
 0x2df   : > { %1105 = vtanh.f32 %v745_v42 }
 0x2e4   : > { %v1100_v43 = vpop.eup %1099 }
 0x2e5   : > { %v1102_v44 = vpop.eup %1101  ;;  %v752_v45 = vadd.f32 1.0, %v1100_v43 }
 0x2e6   : > { %v751_v46 = vadd.f32 1.0, %v1102_v44 }
 0x2e7   : > { %v756_v47 = vmul.f32 0.5, %v752_v45 }
 0x2e8   : > { %v1104_v48 = vpop.eup %1103  ;;  %v755_v49 = vmul.f32 0.5, %v751_v46 }
 0x2e9   : > { %v1106_v50 = vpop.eup %1105  ;;  %v754_v51 = vadd.f32 1.0, %v1104_v48 }
 0x2ea   : > { %v1033_v52 = vpack.c.bf16 %v756_v47, %v755_v49  ;;  %v753_v53 = vadd.f32 1.0, %v1106_v50 }
 0x2eb   : > { %v758_v54 = vmul.f32 0.5, %v754_v51 }
 0x2ec   : > { %v757_v55 = vmul.f32 0.5, %v753_v53  ;;  %1034 = vmatpush3.bf16.msra.mxu1 %v1033_v52 }
 0x2ed   : > { %1035 = vmatprep.subr.bf16.mxu1 %v1174_v25 }
 0x2ee   : > { %v1036_v56 = vpack.c.bf16 %v758_v54, %v757_v55 }
 0x2f0   : > { %1037 = vmatpush3.bf16.msra.mxu1 %v1036_v56 }
 0x2f3   : > { %1014 = vmatmul.mubr.msk.f32.vlgmr.msra.gmra.mrb[4].mxu1 %vm504_vm2, %v759_v57 }
 0x3c6   : > { %v835_v59 = vpop.f32.mrb[4].mxu1 }
 0x3c7   : > { %v836_v60 = vadd.f32 %v835_v59, %v764_v58  ;;  %v1015_v61 = vpop.f32.mrb[5].mxu1 }
 0x3c9   : > { %v839_v62 = vmul.f32 0.5, %v836_v60 }
 0x3cb   : > { %1107 = vtanh.f32 %v839_v62 }
 0x3d5   : > { %v1108_v63 = vpop.eup %1107 }
 0x3d6   : > { %v841_v0 = vadd.f32 1.0, %v1108_v63 }
 0x3d8   : > { %v842_v1 = vmul.f32 0.5, %v841_v0 }
 0x3da   : > { %v843_v2 = vadd.f32 %v842_v1, %v1297_v6 }
 0x3dc   : > { %v844_v3 = vsel %vm372_vm1, %v843_v2, %v1297_v6 }
 0x3dd   : > { %845 = vst [vmem:[%s323_s21] sm:$0xff] %v844_v3 }
 0x3de   : > { %1122 = shalt.err (!%p1119_p3)
}
 0x3df   : > { %s1123_s28 = scalar_lea.hbm %s1383_s25, 128  ;;  %s1127_s21 = scalar_lea.hbm %s1436_s9, 256 }
 0x3e0   : > { %p1124_p4 = scmp.ne.s32.totalorder %s1383_s25, %s1123_s28  ;;  %p1128_p9 = scmp.lt.u32.totalorder %s1383_s25, %s1436_s9 }
 0x3e1   : > { %p1129_p10 = scmp.lt.u32.totalorder %s1127_s21, %s1123_s28  ;;  %p1131_p12 = scmp.lt.u32.totalorder %s1123_s28, %s1383_s25 }
 0x3e2   : > { %p1125_p7 = pnand %p1124_p4, %p1266_p5 }
 0x3e3   : > { %p1130_p11 = por %p1129_p10, %p1128_p9 }
 0x3e4   : > { %p1126_p8 = pneg %p1125_p7 }
 0x3e5   : > { %p1132_p13 = por %p1131_p12, %p1130_p11 }
 0x3e7   : > { %p1133_p0 = pnand %p1132_p13, %p1126_p8 }
 0x3e9   : > { %1136 = shalt.err (!%p1133_p0)
}
 0x3ea   : > { %1038 = dma.vmem_to_hbm [thread:$0]  (%p1266_p5), %s1385_s22, 128, %s1383_s25, %s847_s26  }
 0x3eb PF: > { %p1044_p1 = scmp.ge.s32.totalorder %s1171_s12, 2  ;;  %s872_s13 = sand.u32 1, %s1159_s30  }
 0x3ec   : > { %s873_s27 = scalar_lea.sflag [#allocation3], %s872_s13 }
 0x3ed   : > { %p1041_p2 = pnand %p1044_p1, %p1270_p6 }
 0x3ef   : > { %1154 = dma.done.wait (!%p1041_p2), %s873_s27, 128  }
 0x3f0   : > { %1156 = vsyncadd (!%p1041_p2), %s873_s27, 4294967168  ;;  %p19_p3 = scmp.ge.s32.totalorder %s1253_s15, 4   ;;  %s1439_s30 = smov %s1163_s10 }
 0x3f1   : > { %s1440_s10 = smov %s1167_s11  ;;  %s1441_s11 = smov %s1264_s18 }
 0x3f2   : > { %s1442_s12 = smov %s1253_s15  ;;  %21 = sbr.rel (!%p19_p3) target bundleno = 3 (0x3), region = 91 }
 0x3f9   :  { %878 = vsyncpa [#allocation3], 1 }
 0x3fa   :  { %880 = vsyncpa [#allocation3 + $0x1], 1 }

</bundles_post_ra>
